<compile_context>
chip_gen: v5e
topology: v5e:2x2
jax: 0.10.0
libtpu: 0.0.40
codegen_flags: <defaults>
</compile_context>

<pallas_src>
import functools

import jax
import jax.numpy as jnp
from jax.experimental import pallas as pl
from jax.experimental.pallas import tpu as pltpu


def _round_up(x, m):
    return ((x + m - 1) // m) * m


# -----------------------------------------------------------------------------
# Kernel 1: streaming dense_layer matmul
#   x_right, x_left : (1, F)      float32   (unpadded ViViT hidden states)
#   w1_q            : (F_pad, 128) int8     (zero-padded along F)
#   -> acc          : (2, 128)    float32   (raw accumulator, scale/bias later)
# -----------------------------------------------------------------------------
def dense1_kernel(xr_ref, xl_ref, w_ref, o_ref, *, feat_in, tk, mask_tail):
    k = pl.program_id(0)

    @pl.when(k == 0)
    def _():
        o_ref[...] = jnp.zeros_like(o_ref)

    xr = xr_ref[...]                                   # (1, tk) f32
    xl = xl_ref[...]
    if mask_tail:
        # The last x tile runs past F (weight rows there are zero-padded, but
        # OOB activation reads may hold garbage that must not reach the MXU).
        col = jax.lax.broadcasted_iota(jnp.int32, (1, tk), 1) + k * tk
        valid = col < feat_in
        xr = jnp.where(valid, xr, 0.0)
        xl = jnp.where(valid, xl, 0.0)

    x = jnp.concatenate([xr, xl], axis=0).astype(jnp.bfloat16)     # (2, tk)
    w = w_ref[...].astype(jnp.bfloat16)                            # (tk, 128)
    o_ref[...] += jnp.dot(x, w, preferred_element_type=jnp.float32)


def dense1(x_right, x_left, w1_q, *, feat_in, tk):
    B = 2
    F_pad, N = w1_q.shape
    assert x_right.shape == (1, feat_in) and x_left.shape == (1, feat_in)
    assert F_pad % tk == 0 and F_pad >= feat_in and F_pad - feat_in < tk
    kt = F_pad // tk
    mask_tail = (feat_in % tk) != 0

    # Double-buffered int8 weight tile + two double-buffered f32 x tiles +
    # resident output + headroom; keep under the v7x 64 MiB / TC budget.
    vmem_bytes = (2 * tk * N            # weight tiles, int8
                  + 2 * 2 * tk * 4      # two x inputs, f32, double-buffered
                  + 2 * B * N * 4       # output block
                  + (8 << 20))          # compiler scratch headroom
    vmem_bytes = min(int(vmem_bytes), 56 << 20)

    cost = pl.CostEstimate(
        flops=2 * B * F_pad * N,
        transcendentals=0,
        bytes_accessed=F_pad * N + 2 * feat_in * 4 + B * N * 4,
    )

    kernel = functools.partial(dense1_kernel, feat_in=feat_in, tk=tk,
                               mask_tail=mask_tail)
    return pl.pallas_call(
        kernel,
        out_shape=jax.ShapeDtypeStruct((B, N), jnp.float32),
        grid_spec=pltpu.PrefetchScalarGridSpec(
            num_scalar_prefetch=0,
            grid=(kt,),
            in_specs=[
                pl.BlockSpec((1, tk), lambda k: (0, k)),
                pl.BlockSpec((1, tk), lambda k: (0, k)),
                pl.BlockSpec((tk, N), lambda k: (k, 0)),
            ],
            out_specs=pl.BlockSpec((B, N), lambda k: (0, 0)),
        ),
        compiler_params=pltpu.CompilerParams(
            dimension_semantics=("arbitrary",),
            vmem_limit_bytes=vmem_bytes,
        ),
        cost_estimate=cost,
    )(x_right, x_left, w1_q)


# -----------------------------------------------------------------------------
# Kernel 2: head = int8 dequant + bias1 + dense_layer_2 + masked softmax
#   acc:(2,128) f32, s1:(1,128), b1:(1,128), w2c:(128, 2*O_pad), b2:(1,O_pad)
#   -> logits:(1,O_pad), probs:(1,O_pad)    (softmax masked to n_out columns)
# -----------------------------------------------------------------------------
def head_kernel(acc_ref, s1_ref, b1_ref, w2c_ref, b2_ref,
                logits_ref, probs_ref, *, n_out, o_pad):
    # Per-output-channel dequant scale applied once on the f32 accumulator.
    out1 = acc_ref[...] * s1_ref[...] + b1_ref[...]            # (2, 128) f32
    # dense_layer_2 on the flattened (1, 256) vector expressed as a single
    # (2,128)@(128,2*o_pad) MXU dot against the host-permuted w2 (no in-kernel
    # reshape, no python loop of M=1 dots).
    t = jnp.dot(out1, w2c_ref[...], preferred_element_type=jnp.float32)
    logits = t[0:1, :o_pad] + t[1:2, o_pad:] + b2_ref[...]     # (1, o_pad)
    logits_ref[...] = logits

    # Masked softmax over the real n_out columns (padded w2/b2 columns are
    # zero, so padded logits are exactly 0 and excluded here).
    col = jax.lax.broadcasted_iota(jnp.int32, (1, o_pad), 1)
    masked = jnp.where(col < n_out, logits, -jnp.inf)
    m = jnp.max(masked, axis=-1, keepdims=True)
    e = jnp.exp(masked - m)
    s = jnp.sum(e, axis=-1, keepdims=True)
    probs_ref[...] = e / s


def head(acc, s1, b1, w2c, b2, *, n_out):
    B, N = acc.shape
    H, two_o = w2c.shape
    o_pad = two_o // 2
    assert B == 2 and H == N and b2.shape == (1, o_pad)
    kernel = functools.partial(head_kernel, n_out=n_out, o_pad=o_pad)
    return pl.pallas_call(
        kernel,
        out_shape=(jax.ShapeDtypeStruct((1, o_pad), jnp.float32),
                   jax.ShapeDtypeStruct((1, o_pad), jnp.float32)),
        grid_spec=pltpu.PrefetchScalarGridSpec(
            num_scalar_prefetch=0,
            grid=(1,),
            in_specs=[
                pl.BlockSpec((B, N), lambda i: (0, 0)),
                pl.BlockSpec((1, N), lambda i: (0, 0)),
                pl.BlockSpec((1, N), lambda i: (0, 0)),
                pl.BlockSpec((H, two_o), lambda i: (0, 0)),
                pl.BlockSpec((1, o_pad), lambda i: (0, 0)),
            ],
            out_specs=(pl.BlockSpec((1, o_pad), lambda i: (0, 0)),
                       pl.BlockSpec((1, o_pad), lambda i: (0, 0))),
        ),
    )(acc, s1, b1, w2c, b2)


# -----------------------------------------------------------------------------
# Parameter init (frozen-weight int8 quantization done once, host-side)
# -----------------------------------------------------------------------------
def init_params(key, feat_in, *, hidden1=128, final_num_output=10,
                tk_target=65536):
    tk = min(tk_target, _round_up(feat_in, 128))       # reduction tile (x128)
    feat_pad = _round_up(feat_in, tk)
    hidden2 = 2 * hidden1                               # dense_layer_2 input
    o_pad = _round_up(max(final_num_output, 1), 128)

    k1, k2, k3, k4 = jax.random.split(key, 4)
    # dense_layer: PyTorch stores weight as (out, in); pre-transposed here.
    w1_t = (jax.random.normal(k1, (feat_in, hidden1), jnp.float32)
            / jnp.sqrt(jnp.float32(feat_in)))
    # Symmetric int8 quantization, per output channel.
    s1 = jnp.maximum(jnp.max(jnp.abs(w1_t), axis=0, keepdims=True),
                     1e-12) / 127.0
    w1_q = jnp.clip(jnp.round(w1_t / s1), -127, 127).astype(jnp.int8)
    w1_q = jnp.pad(w1_q, ((0, feat_pad - feat_in), (0, 0)))   # zero tail rows
    b1 = jax.random.normal(k2, (1, hidden1), jnp.float32) * 0.01

    # dense_layer_2 (256 -> final_num_output), columns padded to o_pad.
    w2_t = (jax.random.normal(k3, (hidden2, final_num_output), jnp.float32)
            / jnp.sqrt(jnp.float32(hidden2)))
    w2_t = jnp.pad(w2_t, ((0, 0), (0, o_pad - final_num_output)))
    # Permute so the head can do ONE dot:  w2c[n, b*o_pad + o] = w2_t[b*128+n, o]
    w2c = (w2_t.reshape(2, hidden1, o_pad).transpose(1, 0, 2)
           .reshape(hidden1, 2 * o_pad))
    # INVARIANT: padded b2 / w2 columns must stay zero (masked softmax and the
    # wrapper's [:n_out] slice rely on it).
    b2 = jax.random.normal(k4, (1, final_num_output), jnp.float32) * 0.01
    b2 = jnp.pad(b2, ((0, 0), (0, o_pad - final_num_output)))

    params = {"w1_q": w1_q, "s1": s1, "b1": b1, "w2c": w2c, "b2": b2}
    config = {"feat_in": feat_in, "feat_pad": feat_pad, "tk": tk,
              "n_out": final_num_output, "o_pad": o_pad, "hidden1": hidden1}
    return params, config


# -----------------------------------------------------------------------------
# Model wrapper (no concat / cast / pad of activations in the wrapper)
# -----------------------------------------------------------------------------
def model_forward(last_state_right, last_state_left, params, config):
    # (1, S, D) -> (1, F): contiguous reshape, no HBM traffic.
    xr = last_state_right.reshape(1, -1)
    xl = last_state_left.reshape(1, -1)
    acc = dense1(xr, xl, params["w1_q"],
                 feat_in=config["feat_in"], tk=config["tk"])       # (2, 128)
    logits_pad, probs_pad = head(acc, params["s1"], params["b1"],
                                 params["w2c"], params["b2"],
                                 n_out=config["n_out"])
    n = config["n_out"]
    return logits_pad[0, :n], probs_pad[0, :n]


def reference_forward(last_state_right, last_state_left, params, config):
    # Pure-f32 reference of the same (int8-weight) model: dequantized w1 and
    # f32 activations (the kernel uses bf16 activations -> ~1e-3 deviation).
    feat_in, n_out = config["feat_in"], config["n_out"]
    o_pad, h1 = config["o_pad"], config["hidden1"]
    cat = jnp.concatenate([last_state_right, last_state_left], axis=0)
    flat = cat.reshape(cat.shape[0], -1)                              # (2, F)
    w1 = params["w1_q"][:feat_in].astype(jnp.float32) * params["s1"]
    out1 = flat @ w1 + params["b1"]                                   # (2, 128)
    x2 = out1.reshape(1, -1)                                          # (1, 256)
    w2 = (params["w2c"].reshape(h1, 2, o_pad).transpose(1, 0, 2)
          .reshape(2 * h1, o_pad)[:, :n_out])
    b2 = params["b2"][:, :n_out]
    logits = (x2 @ w2 + b2)[0]
    probs = jax.nn.softmax(logits, axis=-1)
    return logits, probs


if __name__ == "__main__":
    # Small stand-in for the ViViT last hidden states (real model: S=3137,
    # D=768, feat_in = 2,409,216).  S*D deliberately NOT a multiple of the
    # reduction tile so the ragged-tail masking path is exercised.
    S, D = 9, 32
    FINAL_NUM_OUTPUT = 10
    feat_in = S * D                                      # 288

    key = jax.random.PRNGKey(0)
    k_r, k_l, k_p = jax.random.split(key, 3)
    last_state_right = jax.random.normal(k_r, (1, S, D), jnp.float32)
    last_state_left = jax.random.normal(k_l, (1, S, D), jnp.float32)
    # tk_target=128 at test scale -> 3 grid steps incl. a partial tail tile.
    params, config = init_params(k_p, feat_in,
                                 final_num_output=FINAL_NUM_OUTPUT,
                                 tk_target=128)

    logits, probs = model_forward(last_state_right, last_state_left,
                                  params, config)
    jax.block_until_ready((logits, probs))

    ref_logits, ref_probs = reference_forward(last_state_right, last_state_left,
                                              params, config)
    assert logits.shape == (FINAL_NUM_OUTPUT,)
    assert probs.shape == (FINAL_NUM_OUTPUT,)
    assert jnp.allclose(logits, ref_logits, rtol=2e-2, atol=2e-2), (
        float(jnp.max(jnp.abs(logits - ref_logits))))
    assert jnp.allclose(probs, ref_probs, rtol=2e-2, atol=2e-2), (
        float(jnp.max(jnp.abs(probs - ref_probs))))
    assert abs(float(jnp.sum(probs)) - 1.0) < 1e-4

    print("KERNEL_OK")
</pallas_src>

<mosaic_0001>
module attributes {stable_mosaic.version = 11 : i64} {
  func.func @dense1_kernel(%arg0: i32, %arg1: memref<1x128xf32, #tpu.memory_space<vmem>>, %arg2: memref<1x128xf32, #tpu.memory_space<vmem>>, %arg3: memref<128x128xi8, #tpu.memory_space<vmem>>, %arg4: memref<2x128xf32, #tpu.memory_space<vmem>>) attributes {dimension_semantics = [#tpu.dimension_semantics<arbitrary>], iteration_bounds = array<i64: 3>, scalar_prefetch = 0 : i64, scratch_operands = 0 : i64, tpu.core_type = #tpu.core_type<tc>, window_params = [{transform_indices = @transform_0, window_bounds = array<i64: 1, 128>}, {transform_indices = @transform_1, window_bounds = array<i64: 1, 128>}, {transform_indices = @transform_2, window_bounds = array<i64: 128, 128>}, {pipeline_mode = #tpu.pipeline_mode<synchronous>, transform_indices = @transform_3, window_bounds = array<i64: 2, 128>}]} {
    %c0_i32 = arith.constant 0 : i32
    %0 = arith.cmpi eq, %arg0, %c0_i32 : i32
    %1 = arith.extui %0 : i1 to i32
    %c0_i32_0 = arith.constant 0 : i32
    %2 = arith.cmpi ne, %1, %c0_i32_0 : i32
    scf.if %2 {
      %cst_12 = arith.constant 0.000000e+00 : f32
      %23 = vector.broadcast %cst_12 : f32 to vector<2x128xf32>
      %c0_13 = arith.constant 0 : index
      %c0_14 = arith.constant 0 : index
      %24 = vector.load %arg4[%c0_13, %c0_14] : memref<2x128xf32, #tpu.memory_space<vmem>>, vector<2x128xf32>
      tpu.vector_store %arg4[%c0_13, %c0_14], %23 {strides = array<i32>} : memref<2x128xf32, #tpu.memory_space<vmem>>, vector<2x128xf32>,
    } else {
    }
    %c0 = arith.constant 0 : index
    %c0_1 = arith.constant 0 : index
    %3 = vector.load %arg1[%c0, %c0_1] : memref<1x128xf32, #tpu.memory_space<vmem>>, vector<1x128xf32>
    %c0_2 = arith.constant 0 : index
    %c0_3 = arith.constant 0 : index
    %4 = vector.load %arg2[%c0_2, %c0_3] : memref<1x128xf32, #tpu.memory_space<vmem>>, vector<1x128xf32>
    %5 = tpu.iota {dimensions = array<i32: 1>} : vector<1x128xi32>
    %c128_i32 = arith.constant 128 : i32
    %6 = arith.muli %arg0, %c128_i32 : i32
    %7 = vector.broadcast %6 : i32 to vector<1x128xi32>
    %8 = arith.addi %5, %7 : vector<1x128xi32>
    %c288_i32 = arith.constant 288 : i32
    %9 = vector.broadcast %c288_i32 : i32 to vector<1x128xi32>
    %10 = arith.cmpi slt, %8, %9 : vector<1x128xi32>
    %cst = arith.constant 0.000000e+00 : f32
    %11 = vector.broadcast %cst : f32 to vector<1x128xf32>
    %12 = arith.select %10, %3, %11 : vector<1x128xi1>, vector<1x128xf32>
    %cst_4 = arith.constant 0.000000e+00 : f32
    %13 = vector.broadcast %cst_4 : f32 to vector<1x128xf32>
    %14 = arith.select %10, %4, %13 : vector<1x128xi1>, vector<1x128xf32>
    %15 = tpu.concatenate %12, %14 in 0 : vector<1x128xf32>, vector<1x128xf32> -> vector<2x128xf32>
    %16 = arith.truncf %15 : vector<2x128xf32> to vector<2x128xbf16>
    %c0_5 = arith.constant 0 : index
    %c0_6 = arith.constant 0 : index
    %17 = vector.load %arg3[%c0_5, %c0_6] : memref<128x128xi8, #tpu.memory_space<vmem>>, vector<128x128xi8>
    %18 = arith.sitofp %17 : vector<128x128xi8> to vector<128x128xbf16>
    %c0_7 = arith.constant 0 : index
    %c0_8 = arith.constant 0 : index
    %19 = vector.load %arg4[%c0_7, %c0_8] : memref<2x128xf32, #tpu.memory_space<vmem>>, vector<2x128xf32>
    %cst_9 = arith.constant dense<0.000000e+00> : vector<2x128xf32>
    %20 = tpu.matmul %16, %18, %cst_9 {dimension_numbers = #tpu.dot_dimension_numbers<[1], [0], [0], [1], [0, 0, 1, 1], [], []>} : vector<2x128xbf16>, vector<128x128xbf16>, vector<2x128xf32> -> vector<2x128xf32>
    %21 = arith.addf %19, %20 : vector<2x128xf32>
    %c0_10 = arith.constant 0 : index
    %c0_11 = arith.constant 0 : index
    %22 = vector.load %arg4[%c0_10, %c0_11] : memref<2x128xf32, #tpu.memory_space<vmem>>, vector<2x128xf32>
    tpu.vector_store %arg4[%c0_10, %c0_11], %21 {strides = array<i32>} : memref<2x128xf32, #tpu.memory_space<vmem>>, vector<2x128xf32>,
    return
  }
  func.func @transform_0(%arg0: i32) -> (i32, i32) {
    %c0_i32 = arith.constant 0 : i32
    %c0_i32_0 = arith.constant 0 : i32
    return %c0_i32, %arg0 : i32, i32
  }
  func.func @transform_1(%arg0: i32) -> (i32, i32) {
    %c0_i32 = arith.constant 0 : i32
    %c0_i32_0 = arith.constant 0 : i32
    return %c0_i32, %arg0 : i32, i32
  }
  func.func @transform_2(%arg0: i32) -> (i32, i32) {
    %c0_i32 = arith.constant 0 : i32
    %c0_i32_0 = arith.constant 0 : i32
    return %arg0, %c0_i32 : i32, i32
  }
  func.func @transform_3(%arg0: i32) -> (i32, i32) {
    %c0_i32 = arith.constant 0 : i32
    %c0_i32_0 = arith.constant 0 : i32
    %c0_i32_1 = arith.constant 0 : i32
    return %c0_i32, %c0_i32_0 : i32, i32
  }
}

</mosaic_0001>

<bundles_post_ra>
// kernel: tpu_custom_call.1
= control target key start
LH: loop header
LB: loop body
LE: loop exit
PB: predicated region body
PF: predicated region fallthrough
CT: control target
= control target key end

     0   :  { %8 = vsyncpa [#allocation3], 0  ;;  %s838_s0 = inlined_call_operand.hbm [shape: f32[1,288], index: 0, kind: input, shape index: {}]   ;;  %s839_s1 = inlined_call_operand.hbm [shape: f32[1,288], index: 1, kind: input, shape index: {}]   ;;  %s840_s2 = inlined_call_operand.hbm [shape: s8[384,128], index: 2, kind: input, shape index: {}]   ;;  %s841_s3 = inlined_call_operand.hbm [shape: f32[2,128], index: 3, kind: output, shape index: {}]  }
   0x1   :  { %10 = vsyncpa [#allocation3 + $0x1], 0 }
   0x2   :  { %11 = vsyncpa [#allocation6], 0 }
   0x3   :  { %13 = vsyncpa [#allocation6 + $0x1], 0 }
   0x4   :  { %14 = vsyncpa [#allocation4], 0  ;;  %s682_s12 = smov 0   ;;  %s684_s13 = smov 0  }
   0x5   :  { %s686_s14 = smov 0   ;;  %s688_s15 = smov 0  }
   0x6 LB: > { %s701_s16 = sadd.s32 4294967295, %s656_s15   ;;  %s704_s17 = sadd.s32 1, %s656_s15   ;;  %s656_s15 = sphi %s688_s15, %s848_s15   ;;  %s652_s14 = sphi %s686_s14, %s847_s14   ;;  %s648_s13 = sphi %s684_s13, %s846_s13   ;;  %s644_s12 = sphi %s682_s12, %s845_s12  }
   0x7   : > { %s24_s18 = ssub.s32 %s656_s15, %s704_s17  ;;  %s27_s19 = sadd.s32 1, %s652_s14 }
   0x8   : > { %p25_p0 = scmp.eq.s32.totalorder %s24_s18, 0  ;;  %p34_p1 = scmp.ne.s32.totalorder %s652_s14, %s648_s13 }
   0x9   : > { %p35_p2 = scmp.eq.s32.totalorder %s656_s15, 0  ;;  %p40_p3 = scmp.ne.s32.totalorder %s648_s13, %s644_s12 }
   0xa   : > { %s714_s20 = scalar_select %p25_p0, %s652_s14, %s27_s19  }
   0xb   : > { %p36_p4 = por %p35_p2, %p34_p1  ;;  %p41_p5 = scmp.eq.s32.totalorder %s701_s16, 0 }
   0xc   : > { %p457_p6 = scmp.lt.s32.totalorder %s656_s15, 3  ;;  %s723_s22 = sand.u32 1, %s652_s14  }
   0xd   : > { %p718_p7 = por %p41_p5, %p40_p3  ;;  %s154_s24 = sand.u32 1, %s656_s15  }
   0xe   : > { %p725_p8 = pnand %p457_p6, %p36_p4  ;;  %s160_s27 = scalar_lea.hbm %s839_s1, %s656_s15 }
   0xf   : > { %s162_s28 = sshll.u32 %s160_s27, 4  ;;  %s157_s29 = scalar_lea.vmem [#allocation5], %s723_s22  ;;  %s163_s28 = int_to_ptr.hbm [resolvable:$true] %s162_s28 }
  0x10   : > { %s164_s30 = sshll.u32 %s157_s29, 4  ;;  %s735_s4 = scalar_lea.sflag [#allocation6], %s154_s24  ;;  %s165_s30 = int_to_ptr.vmem [resolvable:$true] %s164_s30 }
  0x11   : > { %s496_s5 = sshra.s32 %s163_s28, 4  ;;  %p500_p10 = pneg %p725_p8  ;;  %s497_s5 = int_to_ptr.hbm [resolvable:$true] %s496_s5 }
  0x12   : > { %s498_s6 = scalar_lea.hbm %s497_s5, 1  ;;  %s503_s9 = scalar_lea.hbm %s839_s1, 3 }
  0x13   : > { %p499_p9 = scmp.ne.s32.totalorder %s497_s5, %s498_s6  ;;  %p504_p13 = scmp.lt.s32.totalorder %s497_s5, %s839_s1 }
  0x14   : > { %p505_p0 = scmp.lt.s32.totalorder %s503_s9, %s498_s6 }
  0x15   : > { %p501_p11 = pnand %p500_p10, %p499_p9 }
  0x16   : > { %p506_p1 = por %p505_p0, %p504_p13 }
  0x17   : > { %p502_p12 = pneg %p501_p11 }
  0x19   : > { %p507_p2 = pnand %p506_p1, %p502_p12 }
  0x1b   : > { %510 = shalt.err (!%p507_p2)
}
  0x1c   : > { %453 = dma.hbm_to_vmem [thread:$0]  (!%p725_p8), %s163_s28, 16, %s165_s30, %s735_s4  }
  0x1d   : > { %s425_s12 = sshll.u32 %s723_s22, 5  ;;  %p428_p3 = scmp.ge.s32.totalorder %s656_s15, 1 }
  0x1e   : > { %p191_p4 = scmp.lt.s32.totalorder %s656_s15, 4  ;;  %s143_s24 = scalar_lea.hbm %s838_s0, %s656_s15 }
  0x1f   : > { %s145_s26 = sshll.u32 %s143_s24, 4  ;;  %s140_s27 = scalar_lea.vmem [#allocation2], %s723_s22  ;;  %s146_s26 = int_to_ptr.hbm [resolvable:$true] %s145_s26 }
  0x20   : > { %p758_p5 = pnand %p428_p3, %p191_p4  ;;  %s147_s29 = sshll.u32 %s140_s27, 4  ;;  %s148_s29 = int_to_ptr.vmem [resolvable:$true] %s147_s29 }
  0x21   : > { %s138_s5 = scalar_lea.sflag [#allocation3], %s723_s22  ;;  %s526_s6 = sshra.s32 %s146_s26, 4  ;;  %s527_s6 = int_to_ptr.hbm [resolvable:$true] %s526_s6 }
  0x22   : > { %s528_s28 = scalar_lea.hbm %s527_s6, 1  ;;  %s533_s8 = scalar_lea.hbm %s838_s0, 3 }
  0x23   : > { %p529_p6 = scmp.ne.s32.totalorder %s527_s6, %s528_s28  ;;  %p534_p12 = scmp.lt.s32.totalorder %s527_s6, %s838_s0 }
  0x24   : > { %p535_p13 = scmp.lt.s32.totalorder %s533_s8, %s528_s28 }
  0x25   : > { %p531_p9 = pnand %p529_p6, %p500_p10 }
  0x26   : > { %p536_p0 = por %p535_p13, %p534_p12 }
  0x27   : > { %p532_p11 = pneg %p531_p9 }
  0x29   : > { %p537_p1 = pnand %p536_p0, %p532_p11 }
  0x2b   : > { %540 = shalt.err (!%p537_p1)
}
  0x2c   : > { %450 = dma.hbm_to_vmem [thread:$0]  (!%p725_p8), %s146_s26, 16, %s148_s29, %s138_s5  }
  0x2d   : > { %s436_s22 = sshll.u32 %s656_s15, 5  ;;  %s175_s11 = scalar_lea.vmem [#allocation7], %s425_s12 }
  0x2e   : > { %s183_s18 = sshll.u32 %s175_s11, 4  ;;  %s180_s27 = scalar_lea.hbm %s840_s2, %s436_s22  ;;  %s184_s18 = int_to_ptr.vmem [resolvable:$true] %s183_s18 }
  0x2f   : > { %s181_s30 = sshll.u32 %s180_s27, 4  ;;  %s563_s15 = scalar_lea.hbm %s840_s2, 96  ;;  %s182_s30 = int_to_ptr.hbm [resolvable:$true] %s181_s30 }
  0x30   : > { %s556_s6 = sshra.s32 %s182_s30, 4  ;;  %s557_s6 = int_to_ptr.hbm [resolvable:$true] %s556_s6 }
  0x31   : > { %s558_s28 = scalar_lea.hbm %s557_s6, 32  ;;  %p564_p6 = scmp.lt.s32.totalorder %s557_s6, %s840_s2 }
  0x32   : > { %p559_p2 = scmp.ne.s32.totalorder %s557_s6, %s558_s28  ;;  %p565_p9 = scmp.lt.s32.totalorder %s563_s15, %s558_s28 }
  0x34   : > { %p561_p3 = pnand %p559_p2, %p500_p10  ;;  %p566_p11 = por %p565_p9, %p564_p6 }
  0x36   : > { %p562_p4 = pneg %p561_p3 }
  0x38   : > { %p567_p12 = pnand %p566_p11, %p562_p4 }
  0x3a   : > { %570 = shalt.err (!%p567_p12)
}
  0x3b   : > { %s658_s5 = smov 128   ;;  %s659_s8 = smov 8  }
  0x3c   : > { %456 = dma.hbm_to_vmem [thread:$0]  (!%p725_p8), %s182_s30, 512, %s184_s18, %s735_s4, %s658_s5, %s658_s5, %s659_s8  }
  0x3d   : > { %195 = sbr.rel (%p758_p5) target bundleno = 253 (0xfd), region = 32  ;;  %s794_s9 = sand.u32 (!%p758_p5), 1, %s648_s13  }
  0x3e   : > { %s198_s10 = scalar_lea.sflag (!%p758_p5), [#allocation3], %s794_s9  ;;  %s200_s22 = scalar_lea.vmem (!%p758_p5), [#allocation2], %s794_s9 }
  0x42   : > { %631 = dma.done.wait (%p718_p7), %s198_s10, 16  }
  0x43   : > { %633 = vsyncadd (%p718_p7), %s198_s10, 4294967280  ;;  %s206_s23 = sand.u32 1, %s701_s16   ;;  %s209_s25 = scalar_lea.vmem [#allocation5], %s794_s9 }
  0x44   : > { %s207_s4 = scalar_lea.sflag [#allocation6], %s206_s23 }
  0x45   : > { %635 = dma.done.wait (%p718_p7), %s207_s4, 528  }
  0x46   : > { %637 = vsyncadd (%p718_p7), %s207_s4, 4294966768  ;;  %s429_s11 = sshll.u32 %s794_s9, 5  ;;  %p430_p8 = scmp.ne.s32.totalorder %s701_s16, 0 }
  0x47   : > { %s809_s18 = scalar_lea.vmem [#allocation7], %s429_s11 }
  0x48   : > { %250 = sbr.rel (%p430_p8) target bundleno = 79 (0x4f), region = 48 }
  0x4d   : > { %v660_v0 = vmov 0.0  }
  0x4e   : > { %251 = vst [vmem:[#allocation8] sm:$0x3] %v660_v0 }
  0x4f PF: > { %v271_v1 = vld [vmem:[%s809_s18 + $0x18] sm:$0xff]  ;;  %v270_v2 = vld [vmem:[%s809_s18 + $0x10] sm:$0xff]  ;;  %v269_v19 = vld [vmem:[%s809_s18 + $0x8] sm:$0xff]  ;;  %v254_v20 = vlaneseq  ;;  %s431_s21 = sshll.u32 %s701_s16, 7  ;;  %vm265_vm1 = vcmask 1040384   ;;  %s661_s19 = smov [#allocation8]  }
  0x50   : > { %v286_v3 = vunpack.c.2.s8 %v271_v1  ;;  %v287_v4 = vunpack.c.3.s8 %v271_v1  ;;  %v284_v5 = vunpack.c.0.s8 %v271_v1  ;;  %v285_v6 = vunpack.c.1.s8 %v271_v1  ;;  %v268_v33 = vld [vmem:[%s809_s18] sm:$0xff]  ;;  %v253_v40 = vld [vmem:[%s209_s25] sm:$0x1]  ;;  %s334_s24 = sshll.u32 %s661_s19, 4  ;;  %s336_s6 = sshll.u32 %s841_s3, 4  ;;  %s335_s24 = int_to_ptr.vmem [resolvable:$true] %s334_s24  ;;  %s337_s6 = int_to_ptr.hbm [resolvable:$true] %s336_s6 }
  0x51   : > { %v282_v7 = vunpack.c.2.s8 %v270_v2  ;;  %v283_v8 = vunpack.c.3.s8 %v270_v2  ;;  %v280_v14 = vunpack.c.0.s8 %v270_v2  ;;  %v281_v15 = vunpack.c.1.s8 %v270_v2  ;;  %v252_v47 = vld [vmem:[%s200_s22] sm:$0x1]  ;;  %p458_p7 = scmp.eq.s32.totalorder %s701_s16, 2 }
  0x52   : > { %v302_v9 = vcvt.s32.f32 %v286_v3  ;;  %v303_v10 = vcvt.s32.f32 %v287_v4  ;;  %v300_v11 = vcvt.s32.f32 %v284_v5  ;;  %v301_v12 = vcvt.s32.f32 %v285_v6 }
  0x53   : > { %v298_v17 = vcvt.s32.f32 %v282_v7  ;;  %v299_v18 = vcvt.s32.f32 %v283_v8  ;;  %v296_v21 = vcvt.s32.f32 %v280_v14  ;;  %v297_v22 = vcvt.s32.f32 %v281_v15 }
  0x54   : > { %v311_v13 = vpack.c.bf16 %v303_v10, %v302_v9  ;;  %v310_v16 = vpack.c.bf16 %v301_v12, %v300_v11  ;;  %v278_v24 = vunpack.c.2.s8 %v269_v19  ;;  %v279_v25 = vunpack.c.3.s8 %v269_v19 }
  0x55   : > { %v309_v23 = vpack.c.bf16 %v299_v18, %v298_v17  ;;  %v255_v26 = vand.u32 127, %v254_v20  ;;  %v308_v27 = vpack.c.bf16 %v297_v22, %v296_v21  ;;  %v257_v28 = vstv %s431_s21  ;;  %v312_v56 = vld [vmem:[#allocation8] sm:$0x3] }
  0x56   : > { %313 = vmatpush.bf16.msra.mxu0 %v311_v13  ;;  %v294_v29 = vcvt.s32.f32 %v278_v24  ;;  %v295_v30 = vcvt.s32.f32 %v279_v25  ;;  %v276_v31 = vunpack.c.0.s8 %v269_v19  ;;  %v277_v32 = vunpack.c.1.s8 %v269_v19 }
  0x57   : > { %v258_v34 = vadd.s32 %v257_v28, %v255_v26  ;;  %v274_v35 = vunpack.c.2.s8 %v268_v33  ;;  %v275_v39 = vunpack.c.3.s8 %v268_v33  ;;  %v272_v41 = vunpack.c.0.s8 %v268_v33 }
  0x58   : > { %v307_v36 = vpack.c.bf16 %v295_v30, %v294_v29  ;;  %v292_v37 = vcvt.s32.f32 %v276_v31  ;;  %v293_v38 = vcvt.s32.f32 %v277_v32  ;;  %v273_v45 = vunpack.c.1.s8 %v268_v33 }
  0x59   : > { %vm259_vm0 = vcmp.lt.s32.totalorder %v258_v34, 288  ;;  %v290_v43 = vcvt.s32.f32 %v274_v35  ;;  %v291_v44 = vcvt.s32.f32 %v275_v39  ;;  %v288_v49 = vcvt.s32.f32 %v272_v41 }
  0x5a   : > { %314 = vmatpush.bf16.msra.mxu0 %v310_v16  ;;  %v306_v42 = vpack.c.bf16 %v293_v38, %v292_v37  ;;  %v261_v46 = vsel %vm259_vm0, %v253_v40, 0.0  ;;  %v289_v50 = vcvt.s32.f32 %v273_v45  ;;  %v260_v52 = vsel %vm259_vm0, %v252_v47, 0.0 }
  0x5b   : > { %v305_v48 = vpack.c.bf16 %v291_v44, %v290_v43  ;;  %v263_v51 = vrot.slane %v261_v46, 7 }
  0x5c   : > { %v304_v53 = vpack.c.bf16 %v289_v50, %v288_v49 }
  0x5d   : > { %v266_v54 = vsel %vm265_vm1, %v260_v52, %v263_v51 }
  0x5e   : > { %315 = vmatpush.bf16.msra.mxu0 %v309_v23  ;;  %v267_v55 = vpack.c.bf16 %v266_v54, %v266_v54 }
  0x62   : > { %316 = vmatpush.bf16.msra.mxu0 %v308_v27 }
  0x66   : > { %317 = vmatpush.bf16.msra.mxu0 %v307_v36 }
  0x6a   : > { %318 = vmatpush.bf16.msra.mxu0 %v306_v42 }
  0x6e   : > { %319 = vmatpush.bf16.msra.mxu0 %v305_v48 }
  0x72   : > { %320 = vmatpush.bf16.msra.mxu0 %v304_v53 }
  0x75   : > { %321 = vmatmul.bf16.vlgmr.msra.gmra.mxu0 %v267_v55 }
  0xf2   : > { %v322_v57 = vpop.f32.mrf.mxu0 }
  0xf3   : > { %v326_v58 = vadd.f32 %v322_v57, %v312_v56 }
  0xf5   : > { %327 = vst [vmem:[#allocation8] sm:$0x3] %v326_v58 }
  0xf6   : > { %444 = dma.vmem_to_hbm [thread:$0]  (%p458_p7), %s335_s24, 32, %s337_s6, [#allocation4]  }
  0xfa   : > { %v324_v59 = vpop.f32.mrf.mxu0 }
  0xfb   : > { %639 = dma.done.wait (%p458_p7), [#allocation4], 32  }
  0xfc   : > { %641 = vsyncadd (%p458_p7), [#allocation4], 4294967264 }
  0xfd PF: > { %p17_p10 = scmp.ge.s32.totalorder %s704_s17, 5   ;;  %s845_s12 = smov %s648_s13 }
  0xfe   : > { %s846_s13 = smov %s652_s14  ;;  %s847_s14 = smov %s714_s20 }
  0xff   : > { %s848_s15 = smov %s704_s17  ;;  %19 = sbr.rel (!%p17_p10) target bundleno = 6 (0x6), region = 97 }
 0x104   :  { %350 = vsyncpa [#allocation3], 1 }
 0x105   :  { %352 = vsyncpa [#allocation3 + $0x1], 1 }
 0x106   :  { %353 = vsyncpa [#allocation6], 1 }
 0x107   :  { %355 = vsyncpa [#allocation6 + $0x1], 1 }
 0x108   :  { %356 = vsyncpa [#allocation4], 1 }
 0x109   :  { %358 = vsyncpa [#allocation4 + $0x1], 1 }

</bundles_post_ra>
